<compile_context>
chip_gen: v6e
topology: v6e:2x2x1
jax: 0.10.0
libtpu: 0.0.40
codegen_flags: <defaults>
</compile_context>

<pallas_src>
import functools

import jax
import jax.numpy as jnp
from jax.experimental import pallas as pl
from jax.experimental.pallas import tpu as pltpu

_NIN = 3      # inputs: (a, b, cin)
_HID = 10     # hidden units
_NOUT = 2     # fused heads: row 0 = sum, row 1 = carry
_LANE = 128
_SUB = 8

# Parameter-slab layout (one (16, 128) f32 tile):
#   rows 0..9, cols 0..2 : hidden weights  wh.T     (10, 3)
#   rows 0..9, col  3    : hidden bias     bh       (10,)
#   rows 0..9, col  4    : sum-head weights   ws    (10,)
#   rows 0..9, col  5    : carry-head weights wc    (10,)
#   row  10,   col  6    : sum-head bias   bs
#   row  11,   col  6    : carry-head bias bc
_BH_COL = 3
_WS_COL = 4
_WC_COL = 5
_HB_ROW = 10
_HB_COL = 6


def _sigmoid(z):
    # Exact: sigmoid(z) = 0.5 * tanh(z/2) + 0.5  (single EUP op per element).
    return 0.5 * jnp.tanh(0.5 * z) + 0.5


def _full_adder_kernel(p_ref, x_ref, o_ref):
    pp = p_ref[...]                                    # (16, 128) param slab
    x = x_ref[...]                                     # (3, TB), batch on lanes

    # hidden = sigmoid(Wh @ x + bh): K=3 unrolled VPU broadcast-MACs.
    z = pp[0:_HID, 0:1] * x[0:1, :]
    z = z + pp[0:_HID, 1:2] * x[1:2, :]
    z = z + pp[0:_HID, 2:3] * x[2:3, :]
    h = _sigmoid(z + pp[0:_HID, _BH_COL:_BH_COL + 1])  # (10, TB)

    # heads: scale by the (10,1) weight column, one sublane reduction each.
    o_s = jnp.sum(pp[0:_HID, _WS_COL:_WS_COL + 1] * h, axis=0, keepdims=True)
    o_c = jnp.sum(pp[0:_HID, _WC_COL:_WC_COL + 1] * h, axis=0, keepdims=True)
    o = jnp.concatenate([o_s, o_c], axis=0)            # (2, TB)
    o = o + pp[_HB_ROW:_HB_ROW + _NOUT, _HB_COL:_HB_COL + 1]
    o_ref[...] = _sigmoid(o)                           # (2, TB) lane-dense


def _pack_params(params):
    """Pack (wh, bh, ws, bs, wc, bc) into one (16, 128) f32 slab."""
    wh, bh, ws, bs, wc, bc = params
    p = jnp.zeros((2 * _SUB, _LANE), jnp.float32)
    p = p.at[0:_HID, 0:_NIN].set(wh.T.astype(jnp.float32))        # (10, 3)
    p = p.at[0:_HID, _BH_COL].set(bh.reshape(-1).astype(jnp.float32))
    p = p.at[0:_HID, _WS_COL].set(ws.reshape(-1).astype(jnp.float32))
    p = p.at[0:_HID, _WC_COL].set(wc.reshape(-1).astype(jnp.float32))
    p = p.at[_HB_ROW, _HB_COL].set(bs.reshape(-1)[0].astype(jnp.float32))
    p = p.at[_HB_ROW + 1, _HB_COL].set(bc.reshape(-1)[0].astype(jnp.float32))
    return p


def _round_up(v, m):
    return ((v + m - 1) // m) * m


def full_adder_lanes(x_t, params, *, tile_b=32768):
    """Lane-major entry point. x_t: (3, B) float32 (batch on the lane axis).

    Returns (2, B) float32: row 0 = sum head, row 1 = carry head.
    """
    B = x_t.shape[1]
    p = _pack_params(params)

    # Balanced, lane-aligned tiling; >=2 grid steps when there is more than
    # one lane-tile of work so v7x's two TensorCores both get a share.
    tile_b = max(_LANE, min((tile_b // _LANE) * _LANE, 65536))
    b_lanes = _round_up(max(B, 1), _LANE)
    n_tiles = pl.cdiv(b_lanes, tile_b)
    if b_lanes >= 2 * _LANE:
        n_tiles = max(n_tiles, 2)
    tb = _round_up(pl.cdiv(b_lanes, n_tiles), _LANE)
    b_pad = n_tiles * tb

    x_pad = jnp.pad(x_t.astype(jnp.float32), ((0, 0), (0, b_pad - B)))

    out = pl.pallas_call(
        _full_adder_kernel,
        out_shape=jax.ShapeDtypeStruct((_NOUT, b_pad), jnp.float32),
        grid=(n_tiles,),
        in_specs=[
            pl.BlockSpec((2 * _SUB, _LANE), lambda i: (0, 0)),  # params resident
            pl.BlockSpec((_NIN, tb), lambda i: (0, i)),         # x tile (3, TB)
        ],
        out_specs=pl.BlockSpec((_NOUT, tb), lambda i: (0, i)),  # (2, TB)
        compiler_params=pltpu.CompilerParams(
            dimension_semantics=("parallel",),
            # Large lane tiles + Mosaic temporaries exceed v5e's 16 MiB
            # default scoped VMEM; 48 MiB fits every chip's physical VMEM.
            vmem_limit_bytes=48 * 1024 * 1024,
        ),
    )(p, x_pad)
    return out[:, :B]


@functools.partial(jax.jit, static_argnames=("tile_b",))
def full_adder_nn(x, params, *, tile_b=32768):
    """PyTorch-layout wrapper. x: (B, 3) -> (sum_out, carry_out), each (B, 1).

    The (B,3)->(3,B) transpose/pad and the de-pad epilogue run inside this
    jit; callers who already hold (3, B) data can use full_adder_lanes().
    """
    out = full_adder_lanes(x.T, params, tile_b=tile_b)
    return out[0:1, :].T, out[1:2, :].T


def init_params(key):
    """Deterministic init mirroring PyTorch nn.Linear default:
    U(-1/sqrt(fan_in), 1/sqrt(fan_in)) for weights and biases."""
    k = jax.random.split(key, 6)

    def linear(kw, kb, fan_in, fan_out):
        bound = 1.0 / jnp.sqrt(fan_in)
        w = jax.random.uniform(kw, (fan_in, fan_out), jnp.float32, -bound, bound)
        b = jax.random.uniform(kb, (1, fan_out), jnp.float32, -bound, bound)
        return w, b

    wh, bh = linear(k[0], k[1], 3, 10)    # hidden:       Linear(3, 10)
    ws, bs = linear(k[2], k[3], 10, 1)    # output_sum:   Linear(10, 1)
    wc, bc = linear(k[4], k[5], 10, 1)    # output_carry: Linear(10, 1)
    return wh, bh, ws, bs, wc, bc


def reference(x, params):
    wh, bh, ws, bs, wc, bc = params
    h = jax.nn.sigmoid(x @ wh + bh)
    return jax.nn.sigmoid(h @ ws + bs), jax.nn.sigmoid(h @ wc + bc)


if __name__ == "__main__":
    key = jax.random.PRNGKey(0)
    k_param, _ = jax.random.split(key)
    params = init_params(k_param)

    # All 8 full-adder input combinations (a, b, cin) as the batch.
    x8 = jnp.array(
        [[a, b, c] for a in (0.0, 1.0) for b in (0.0, 1.0) for c in (0.0, 1.0)],
        dtype=jnp.float32,
    )  # (8, 3)
    s8, c8 = full_adder_nn(x8, params)
    jax.block_until_ready((s8, c8))
    r_s, r_c = reference(x8, params)
    assert s8.shape == (8, 1) and c8.shape == (8, 1)
    assert jnp.allclose(s8, r_s, atol=1e-4)
    assert jnp.allclose(c8, r_c, atol=1e-4)

    # Larger ragged batch: exercises lane padding + multi-tile parallel grid.
    xb = jax.random.uniform(jax.random.PRNGKey(1), (1030, 3), jnp.float32)
    sb, cb = full_adder_nn(xb, params)
    jax.block_until_ready((sb, cb))
    rsb, rcb = reference(xb, params)
    assert sb.shape == (1030, 1) and cb.shape == (1030, 1)
    assert jnp.allclose(sb, rsb, atol=1e-4)
    assert jnp.allclose(cb, rcb, atol=1e-4)

    print("KERNEL_OK")
</pallas_src>

<mosaic_0001>
module attributes {stable_mosaic.version = 11 : i64} {
  func.func @_full_adder_kernel(%arg0: i32, %arg1: memref<16x128xf32, #tpu.memory_space<vmem>>, %arg2: memref<3x128xf32, #tpu.memory_space<vmem>>, %arg3: memref<2x128xf32, #tpu.memory_space<vmem>>) attributes {dimension_semantics = [#tpu.dimension_semantics<parallel>], iteration_bounds = array<i64: 1>, scalar_prefetch = 0 : i64, scratch_operands = 0 : i64, tpu.core_type = #tpu.core_type<tc>, window_params = [{pipeline_mode = #tpu.pipeline_mode<synchronous>, transform_indices = @transform_0, window_bounds = array<i64: 16, 128>}, {transform_indices = @transform_1, window_bounds = array<i64: 3, 128>}, {transform_indices = @transform_2, window_bounds = array<i64: 2, 128>}]} {
    %c0 = arith.constant 0 : index
    %c0_0 = arith.constant 0 : index
    %0 = vector.load %arg1[%c0, %c0_0] : memref<16x128xf32, #tpu.memory_space<vmem>>, vector<16x128xf32>
    %c0_1 = arith.constant 0 : index
    %c0_2 = arith.constant 0 : index
    %1 = vector.load %arg2[%c0_1, %c0_2] : memref<3x128xf32, #tpu.memory_space<vmem>>, vector<3x128xf32>
    %2 = vector.extract_strided_slice %0 {offsets = [0, 0], sizes = [10, 1], strides = [1, 1]} : vector<16x128xf32> to vector<10x1xf32>
    %3 = vector.extract_strided_slice %1 {offsets = [0, 0], sizes = [1, 128], strides = [1, 1]} : vector<3x128xf32> to vector<1x128xf32>
    %4 = vector.broadcast %2 : vector<10x1xf32> to vector<10x128xf32>
    %5 = vector.broadcast %3 : vector<1x128xf32> to vector<10x128xf32>
    %6 = arith.mulf %4, %5 : vector<10x128xf32>
    %7 = vector.extract_strided_slice %0 {offsets = [0, 1], sizes = [10, 1], strides = [1, 1]} : vector<16x128xf32> to vector<10x1xf32>
    %8 = vector.extract_strided_slice %1 {offsets = [1, 0], sizes = [1, 128], strides = [1, 1]} : vector<3x128xf32> to vector<1x128xf32>
    %9 = vector.broadcast %7 : vector<10x1xf32> to vector<10x128xf32>
    %10 = vector.broadcast %8 : vector<1x128xf32> to vector<10x128xf32>
    %11 = arith.mulf %9, %10 : vector<10x128xf32>
    %12 = arith.addf %6, %11 : vector<10x128xf32>
    %13 = vector.extract_strided_slice %0 {offsets = [0, 2], sizes = [10, 1], strides = [1, 1]} : vector<16x128xf32> to vector<10x1xf32>
    %14 = vector.extract_strided_slice %1 {offsets = [2, 0], sizes = [1, 128], strides = [1, 1]} : vector<3x128xf32> to vector<1x128xf32>
    %15 = vector.broadcast %13 : vector<10x1xf32> to vector<10x128xf32>
    %16 = vector.broadcast %14 : vector<1x128xf32> to vector<10x128xf32>
    %17 = arith.mulf %15, %16 : vector<10x128xf32>
    %18 = arith.addf %12, %17 : vector<10x128xf32>
    %19 = vector.extract_strided_slice %0 {offsets = [0, 3], sizes = [10, 1], strides = [1, 1]} : vector<16x128xf32> to vector<10x1xf32>
    %20 = vector.broadcast %19 : vector<10x1xf32> to vector<10x128xf32>
    %21 = arith.addf %18, %20 : vector<10x128xf32>
    %cst = arith.constant 5.000000e-01 : f32
    %22 = vector.broadcast %cst : f32 to vector<10x128xf32>
    %23 = arith.mulf %22, %21 : vector<10x128xf32>
    %24 = math.tanh %23 : vector<10x128xf32>
    %cst_3 = arith.constant 5.000000e-01 : f32
    %25 = vector.broadcast %cst_3 : f32 to vector<10x128xf32>
    %26 = arith.mulf %25, %24 : vector<10x128xf32>
    %cst_4 = arith.constant 5.000000e-01 : f32
    %27 = vector.broadcast %cst_4 : f32 to vector<10x128xf32>
    %28 = arith.addf %26, %27 : vector<10x128xf32>
    %29 = vector.extract_strided_slice %0 {offsets = [0, 4], sizes = [10, 1], strides = [1, 1]} : vector<16x128xf32> to vector<10x1xf32>
    %30 = vector.broadcast %29 : vector<10x1xf32> to vector<10x128xf32>
    %31 = arith.mulf %30, %28 : vector<10x128xf32>
    %cst_5 = arith.constant dense<0.000000e+00> : vector<128xf32>
    %32 = vector.multi_reduction <add>, %31, %cst_5 [0] : vector<10x128xf32> to vector<128xf32>
    %33 = vector.shape_cast %32 : vector<128xf32> to vector<1x128xf32>
    %34 = vector.extract_strided_slice %0 {offsets = [0, 5], sizes = [10, 1], strides = [1, 1]} : vector<16x128xf32> to vector<10x1xf32>
    %35 = vector.broadcast %34 : vector<10x1xf32> to vector<10x128xf32>
    %36 = arith.mulf %35, %28 : vector<10x128xf32>
    %cst_6 = arith.constant dense<0.000000e+00> : vector<128xf32>
    %37 = vector.multi_reduction <add>, %36, %cst_6 [0] : vector<10x128xf32> to vector<128xf32>
    %38 = vector.shape_cast %37 : vector<128xf32> to vector<1x128xf32>
    %39 = tpu.concatenate %33, %38 in 0 : vector<1x128xf32>, vector<1x128xf32> -> vector<2x128xf32>
    %40 = vector.extract_strided_slice %0 {offsets = [10, 6], sizes = [2, 1], strides = [1, 1]} : vector<16x128xf32> to vector<2x1xf32>
    %41 = vector.broadcast %40 : vector<2x1xf32> to vector<2x128xf32>
    %42 = arith.addf %39, %41 : vector<2x128xf32>
    %cst_7 = arith.constant 5.000000e-01 : f32
    %43 = vector.broadcast %cst_7 : f32 to vector<2x128xf32>
    %44 = arith.mulf %43, %42 : vector<2x128xf32>
    %45 = math.tanh %44 : vector<2x128xf32>
    %cst_8 = arith.constant 5.000000e-01 : f32
    %46 = vector.broadcast %cst_8 : f32 to vector<2x128xf32>
    %47 = arith.mulf %46, %45 : vector<2x128xf32>
    %cst_9 = arith.constant 5.000000e-01 : f32
    %48 = vector.broadcast %cst_9 : f32 to vector<2x128xf32>
    %49 = arith.addf %47, %48 : vector<2x128xf32>
    %c0_10 = arith.constant 0 : index
    %c0_11 = arith.constant 0 : index
    %50 = vector.load %arg3[%c0_10, %c0_11] : memref<2x128xf32, #tpu.memory_space<vmem>>, vector<2x128xf32>
    tpu.vector_store %arg3[%c0_10, %c0_11], %49 {strides = array<i32>} : memref<2x128xf32, #tpu.memory_space<vmem>>, vector<2x128xf32>,
    return
  }
  func.func @transform_0(%arg0: i32) -> (i32, i32) {
    %c0_i32 = arith.constant 0 : i32
    %c0_i32_0 = arith.constant 0 : i32
    %c0_i32_1 = arith.constant 0 : i32
    return %c0_i32, %c0_i32_0 : i32, i32
  }
  func.func @transform_1(%arg0: i32) -> (i32, i32) {
    %c0_i32 = arith.constant 0 : i32
    %c0_i32_0 = arith.constant 0 : i32
    return %c0_i32, %arg0 : i32, i32
  }
  func.func @transform_2(%arg0: i32) -> (i32, i32) {
    %c0_i32 = arith.constant 0 : i32
    %c0_i32_0 = arith.constant 0 : i32
    return %c0_i32, %arg0 : i32, i32
  }
}

</mosaic_0001>

<bundles_post_ra>
// kernel: full_adder_nn.1
= control target key start
LH: loop header
LB: loop body
LE: loop exit
PB: predicated region body
PF: predicated region fallthrough
CT: control target
= control target key end

     0   :  { %v160_v0 = vmov 0   ;;  %v161_v3 = vmov 1   ;;  %v162_v4 = vmov 2   ;;  %v163_v5 = vmov 3   ;;  %s194_s0 = inlined_call_operand.vmem [shape: f32[16,128], index: 0, kind: input, shape index: {}]   ;;  %s195_s1 = inlined_call_operand.vmem [shape: f32[3,128], index: 1, kind: input, shape index: {}]   ;;  %s196_s2 = inlined_call_operand.vmem [shape: f32[2,128], index: 2, kind: output, shape index: {}]  }
   0x1   :  { %143 = vset.pattern.permute.xlu1 %v160_v0  ;;  %141 = vset.pattern.permute.xlu0 %v160_v0  ;;  %v12_v1 = vld [vmem:[%s194_s0 + $0x8] sm:$0xff]  ;;  %v11_v2 = vld [vmem:[%s194_s0] sm:$0xff]  ;;  %v164_v6 = vmov 4   ;;  %v165_v7 = vmov 5   ;;  %v166_v8 = vmov 6   ;;  %v24_v9 = vlaneseq }
   0x2   :  { %21 = vperm.xlu0 %141, %v12_v1   ;;  %16 = vperm.xlu1 %143, %v11_v2   ;;  %v13_v15 = vld [vmem:[%s195_s1] sm:$0x7]  ;;  %vm90_vm0 = vcmask 1041408   ;;  %vm117_vm1 = vcmask 1040384  }
   0x3   :  { %v25_v10 = vshrl.u32 %v24_v9, 7 }
   0x5   :  { %v40_v11 = vsub.s32 1, %v25_v10  ;;  %v26_v14 = vsub.s32 0, %v25_v10  ;;  %v56_v17 = vsub.s32 2, %v25_v10 }
   0x6   :  { %142 = vset.pattern.permute.xlu0 %v161_v3  ;;  %144 = vset.pattern.permute.xlu1 %v161_v3 }
   0x7   :  { %35 = vperm.xlu0 %142, %v12_v1   ;;  %31 = vperm.xlu1 %144, %v11_v2   ;;  %v41_v16 = vrot.slane %v13_v15, %v40_v11  ;;  %v27_v18 = vrot.slane %v13_v15, %v26_v14  ;;  %v57_v23 = vrot.slane %v13_v15, %v56_v17 }
   0xb   :  { %146 = vset.pattern.permute.xlu0 %v162_v4  ;;  %145 = vset.pattern.permute.xlu1 %v162_v4 }
   0xc   :  { %47 = vperm.xlu0 %146, %v11_v2   ;;  %51 = vperm.xlu1 %145, %v12_v1  }
  0x10   :  { %147 = vset.pattern.permute.xlu1 %v163_v5  ;;  %148 = vset.pattern.permute.xlu0 %v164_v6 }
  0x11   :  { %67 = vperm.xlu1 %147, %v12_v1   ;;  %85 = vperm.xlu0 %148, %v12_v1  }
  0x15   :  { %63 = vperm.xlu1 %147, %v11_v2   ;;  %151 = vset.pattern.permute.xlu0 %v165_v7 }
  0x16   :  { %100 = vperm.xlu0 %151, %v11_v2  }
  0x19   :  { %149 = vset.pattern.permute.xlu1 %v165_v7 }
  0x1a   :  { %104 = vperm.xlu1 %149, %v12_v1   ;;  %153 = vset.pattern.permute.xlu0 %v166_v8 }
  0x1e   :  { %150 = vset.pattern.permute.xlu1 %v164_v6 }
  0x1f   :  { %81 = vperm.xlu1 %150, %v11_v2  }
  0x23   :  { %152 = vset.pattern.permute.xlu1 %v166_v8 }
  0x24   :  { %120 = vperm.xlu1 %152, %v12_v1  }
  0x7d   :  { %v17_v12 = vpop.permute.xlu1 %16  ;;  %v22_v13 = vpop.permute.xlu0 %21 }
  0x7e   :  { %v29_v21 = vmul.f32 %v27_v18, %v22_v13  ;;  %v28_v30 = vmul.f32 %v27_v18, %v17_v12 }
  0x82   :  { %v36_v19 = vpop.permute.xlu0 %35  ;;  %v32_v20 = vpop.permute.xlu1 %31 }
  0x83   :  { %v43_v22 = vmul.f32 %v41_v16, %v36_v19  ;;  %v42_v28 = vmul.f32 %v41_v16, %v32_v20 }
  0x85   :  { %v45_v25 = vadd.f32 %v43_v22, %v29_v21  ;;  %v44_v33 = vadd.f32 %v42_v28, %v28_v30 }
  0x87   :  { %v52_v24 = vpop.permute.xlu1 %51  ;;  %v48_v26 = vpop.permute.xlu0 %47 }
  0x88   :  { %v59_v27 = vmul.f32 %v57_v23, %v52_v24  ;;  %v58_v31 = vmul.f32 %v57_v23, %v48_v26 }
  0x8a   :  { %v61_v29 = vadd.f32 %v59_v27, %v45_v25  ;;  %v60_v36 = vadd.f32 %v58_v31, %v44_v33 }
  0x8c   :  { %v68_v32 = vpop.permute.xlu1 %67  ;;  %v86_v41 = vpop.permute.xlu0 %85 }
  0x8d   :  { %v71_v34 = vadd.f32 %v68_v32, %v61_v29 }
  0x8f   :  { %v73_v35 = vmul.f32 0.5, %v71_v34 }
  0x90   :  { %v64_v37 = vpop.permute.xlu1 %63 }
  0x91   :  { %154 = vtanh.f32 %v73_v35  ;;  %v70_v38 = vadd.f32 %v64_v37, %v60_v36  ;;  %v101_v49 = vpop.permute.xlu0 %100 }
  0x93   :  { %v72_v39 = vmul.f32 0.5, %v70_v38 }
  0x95   :  { %156 = vtanh.f32 %v72_v39  ;;  %v105_v42 = vpop.permute.xlu1 %104 }
  0x9a   :  { %v82_v50 = vpop.permute.xlu1 %81 }
  0x9e   :  { %v155_v40 = vpop.eup %154 }
  0x9f   :  { %v77_v43 = vmul.f32 0.5, %v155_v40  ;;  %v121_v2 = vpop.permute.xlu1 %120 }
  0xa0   :  { %v122_v5 = vrot.slane %v121_v2, 2 }
  0xa1   :  { %v79_v44 = vadd.f32 0.5, %v77_v43 }
  0xa2   :  { %v157_v45 = vpop.eup %156 }
  0xa3   :  { %v76_v46 = vmul.f32 0.5, %v157_v45  ;;  %v89_v47 = vmul.f32 %v86_v41, %v79_v44  ;;  %v108_v48 = vmul.f32 %v105_v42, %v79_v44 }
  0xa5   :  { %v78_v51 = vadd.f32 0.5, %v76_v46  ;;  %v91_v54 = vsel %vm90_vm0, %v89_v47, 0.0  ;;  %v109_v55 = vsel %vm90_vm0, %v108_v48, 0.0 }
  0xa7   :  { %v107_v52 = vmul.f32 %v101_v49, %v78_v51  ;;  %v88_v53 = vmul.f32 %v82_v50, %v78_v51 }
  0xa9   :  { %v110_v56 = vadd.f32 %v109_v55, %v107_v52  ;;  %v92_v57 = vadd.f32 %v91_v54, %v88_v53 }
  0xab   :  { %v111_v58 = vrot.slane %v110_v56, 4  ;;  %v93_v59 = vrot.slane %v92_v57, 4 }
  0xad   :  { %v112_v60 = vadd.f32 %v111_v58, %v110_v56  ;;  %v94_v61 = vadd.f32 %v93_v59, %v92_v57 }
  0xaf   :  { %v113_v62 = vrot.slane %v112_v60, 2  ;;  %v95_v63 = vrot.slane %v94_v61, 2 }
  0xb1   :  { %v114_v0 = vadd.f32 %v113_v62, %v112_v60  ;;  %v96_v1 = vadd.f32 %v95_v63, %v94_v61 }
  0xb3   :  { %v115_v3 = vrot.slane %v114_v0, 1  ;;  %v97_v4 = vrot.slane %v96_v1, 1 }
  0xb5   :  { %v98_v6 = vadd.f32 %v97_v4, %v96_v1  ;;  %v116_v7 = vadd.f32 %v115_v3, %v114_v0 }
  0xb7   :  { %v118_v8 = vsel %vm117_vm1, %v98_v6, %v116_v7 }
  0xb8   :  { %v124_v9 = vadd.f32 %v122_v5, %v118_v8 }
  0xba   :  { %v125_v10 = vmul.f32 0.5, %v124_v9 }
  0xbc   :  { %158 = vtanh.f32 %v125_v10 }
  0xc9   :  { %v159_v11 = vpop.eup %158 }
  0xca   :  { %v127_v12 = vmul.f32 0.5, %v159_v11 }
  0xcc   :  { %v128_v13 = vadd.f32 0.5, %v127_v12 }
  0xce   :  { %129 = vst [vmem:[%s196_s2] sm:$0x3] %v128_v13 }

</bundles_post_ra>
